<compile_context>
chip_gen: v7x
topology: tpu7x:2x2x1
jax: 0.10.0
libtpu: 0.0.40
codegen_flags: <defaults>
</compile_context>

<pallas_src>
import jax
import jax.numpy as jnp
from jax.experimental import pallas as pl
from jax.experimental.pallas import tpu as pltpu


_VMEM_HEADROOM = 8 * 2**20     # Mosaic internal scratch / layout slack
_F32_TMP_WIDTHS = 16           # f32 C-wide temporaries per row: (tile,3C) mod (3)
                               # + 3 sliced/bias-added chunks + x, x*x, x_norm,
                               # out_f32, c_f32, c_act, ... (generous count)


def _round_up(x: int, m: int) -> int:
    return ((x + m - 1) // m) * m


def _vmem_profile():
    """(capacity, is_small_vmem, vmem_limit_cap) -- generation aware.

    v7x has 64 MiB VMEM per TensorCore (cap the scoped limit at ~46 MiB and
    keep real headroom); v5e/v6e have 128 MiB (let the limit grow to ~100 MiB
    so row tiles can reach 512-1024).
    """
    cap = 0
    try:
        cap = int(getattr(pltpu.get_tpu_info(), "vmem_capacity_bytes", 0))
    except Exception:
        cap = 0
    if cap <= 0:
        cap = 128 * 2**20                       # v5e / v6e default
    small = cap <= 80 * 2**20                   # v7x-class
    if small:
        limit_cap = min(46 * 2**20, cap - 16 * 2**20)
    else:
        limit_cap = min(100 * 2**20, cap - 24 * 2**20)
    return cap, small, max(limit_cap, 16 * 2**20)


def _pick_tile_n(R: int, C: int, io_itemsize: int, w_bytes: int,
                 limit_cap: int, small_vmem: bool) -> int:
    """Row-tile size from the generation-aware VMEM budget.

    Per row (pipelined working set, resident weight excluded):
      8 C-widths of io dtype  -> x/c/out/gate blocks, double-buffered
      ~16 C-widths of f32     -> (tile, 3C) mod, chunk slices, LN temporaries
    """
    per_row = 8 * C * io_itemsize + _F32_TMP_WIDTHS * 4 * C
    tile_budget = max(limit_cap - _VMEM_HEADROOM - w_bytes, 4 * 2**20)
    tile = int(tile_budget // max(per_row, 1))
    tile = max(8, min(1024, tile))
    if tile >= 128:
        tile = (tile // 128) * 128      # MXU-friendly on v5e (4x128^2) and v6e/v7x
    else:
        tile = (tile // 8) * 8
    tile = min(tile, _round_up(R, 8))
    if small_vmem and R > 8:
        # v7x: two TensorCores share the 1-D "parallel" row grid -> keep at
        # least two row tiles so neither core idles.
        tile = min(tile, _round_up(pl.cdiv(R, 2), 8))
    return max(8, tile)


def _adaln_zero_kernel(x_ref, c_ref, w_ref, b_ref, out_ref, gate_ref):
    # x/c/out/gate refs: (tile_n, C); w_ref: (C, 3C) resident; b_ref: (1, 3C) f32.
    C = out_ref.shape[-1]

    # SiLU on the conditioning tensor. If c already matches the matmul dtype
    # (bf16 on v6e/v7x fast path), compute directly -- no f32 upcast, half the
    # vreg/VMEM pressure. Otherwise run SiLU in f32 and cast only the matmul
    # operand down so the MXU stays on its bf16 path.
    c_val = c_ref[...]
    if c_val.dtype == w_ref.dtype:
        c_act = c_val * jax.nn.sigmoid(c_val)
    else:
        c32 = c_val.astype(jnp.float32)
        c_act = (c32 * jax.nn.sigmoid(c32)).astype(w_ref.dtype)

    # One fused (tile_n, C) x (C, 3C) projection, f32 accumulation on the MXU.
    mod = jnp.dot(c_act, w_ref[...], preferred_element_type=jnp.float32)

    # Bias added per C-chunk after slicing (no full (tile_n, 3C) second temp).
    # The scale chunk of the bias already has the modulate "+1" folded in.
    b = b_ref[...].astype(jnp.float32)
    shift = mod[:, 0 * C:1 * C] + b[:, 0 * C:1 * C]
    scale_p1 = mod[:, 1 * C:2 * C] + b[:, 1 * C:2 * C]
    gate = mod[:, 2 * C:3 * C] + b[:, 2 * C:3 * C]

    # LayerNorm over the last dim: biased variance, eps=1e-6, no affine.
    # Single pass (sum / sum-of-squares); clamp the variance against f32
    # cancellation so rsqrt never sees a tiny negative.
    x = x_ref[...].astype(jnp.float32)
    inv_c = jnp.float32(1.0 / C)
    mean = jnp.sum(x, axis=-1, keepdims=True) * inv_c
    mean_sq = jnp.sum(x * x, axis=-1, keepdims=True) * inv_c
    var = jnp.maximum(mean_sq - mean * mean, 0.0)
    x_norm = (x - mean) * jax.lax.rsqrt(var + jnp.float32(1e-6))

    # modulate(x_norm, shift, scale) = x_norm * (1 + scale) + shift
    out_ref[...] = (x_norm * scale_p1 + shift).astype(out_ref.dtype)
    gate_ref[...] = gate.astype(gate_ref.dtype)


def prepare_adaln_params(weight, bias, *, matmul_dtype=jnp.bfloat16):
    """Reorganize the PyTorch Linear params once (cache per module).

    weight: (3C, C) nn.Linear layout; bias: (3C,).
    Returns:
      w_t: (C, 3C) in `matmul_dtype` (bf16 by default -> MXU fast path, half
           the resident VMEM footprint), shift|scale|gate lane-contiguous.
      b:   (1, 3C) f32 with the modulate "+1" folded into the scale chunk.
    """
    three_c, C = weight.shape
    assert three_c == 3 * C and bias.shape == (three_c,)
    w_t = jnp.asarray(weight).T.astype(matmul_dtype)          # (C, 3C)
    b = jnp.asarray(bias).astype(jnp.float32).reshape(1, 3 * C)
    b = b.at[:, C:2 * C].add(1.0)                              # fold "+1"
    return w_t, b


def ada_layer_norm_zero(x, c, w_t, b, *, tile_n=None, interpret=False):
    """x, c: (B, N, C); w_t: (C, 3C), b: (1, 3C) from prepare_adaln_params."""
    B, N, C = x.shape
    assert c.shape == (B, N, C)
    assert w_t.shape == (C, 3 * C) and b.shape == (1, 3 * C)
    # NOTE: the module's conditioning c is per-token (B, N, C) by spec, so the
    # projection is computed per token (not per sample).
    # TODO(synk): for C not a multiple of 128, pad C with masked LN stats for
    # lane-dense stores; for very large C on v7x (C*3C bf16 approaching 64 MiB)
    # add a weight-slab path (column-split shift/scale/gate matmuls or an
    # emit_pipeline over weight slabs with memory_space=pl.ANY).

    R = B * N
    x2 = x.reshape(R, C)           # contiguous merge of leading dims: no copy
    c2 = c.reshape(R, C)

    _, small_vmem, limit_cap = _vmem_profile()
    w_bytes = w_t.size * w_t.dtype.itemsize + b.size * b.dtype.itemsize

    if tile_n is None:
        tile_n = _pick_tile_n(R, C, x.dtype.itemsize, w_bytes,
                              limit_cap, small_vmem)
    tile_n = max(8, _round_up(min(int(tile_n), _round_up(R, 8)), 8))

    # Ragged last tile is handled by Pallas edge-block masking: out-of-range
    # rows may compute garbage (never NaN-trapping ops) but are never written.
    grid = (pl.cdiv(R, tile_n),)

    row_spec = pl.BlockSpec((tile_n, C), lambda i: (i, 0))
    # Whole-array VMEM residents: one copy, no per-step double-buffering.
    resident_vmem = pl.BlockSpec(memory_space=pltpu.MemorySpace.VMEM)

    # Explicit, generation-aware VMEM budget: resident weight/bias +
    # double-buffered row tiles + f32 temporaries (incl. the (tile_n, 3C) mod)
    # + headroom, clamped to the per-generation cap.
    io_bytes = 8 * tile_n * C * x.dtype.itemsize
    f32_tmp_bytes = _F32_TMP_WIDTHS * 4 * tile_n * C
    vmem_limit = int(min(
        limit_cap,
        max(16 * 2**20, w_bytes + io_bytes + f32_tmp_bytes + _VMEM_HEADROOM),
    ))

    out2, gate2 = pl.pallas_call(
        _adaln_zero_kernel,
        out_shape=(
            jax.ShapeDtypeStruct((R, C), x.dtype),
            jax.ShapeDtypeStruct((R, C), x.dtype),
        ),
        grid=grid,
        in_specs=[row_spec, row_spec, resident_vmem, resident_vmem],
        out_specs=(row_spec, row_spec),
        compiler_params=pltpu.CompilerParams(
            dimension_semantics=("parallel",),
            vmem_limit_bytes=vmem_limit,
        ),
        interpret=interpret,
    )(x2, c2, w_t, b)

    return out2.reshape(B, N, C), gate2.reshape(B, N, C)


def _reference(x, c, weight, bias, matmul_dtype=jnp.float32):
    """Pure-JAX reference mirroring the PyTorch forward (weight in (3C, C)).

    matmul_dtype=bf16 mirrors the kernel's bf16-MXU math for tight checks;
    matmul_dtype=f32 is the exact PyTorch-equivalent math.
    """
    c_act = c.astype(jnp.float32) * jax.nn.sigmoid(c.astype(jnp.float32))
    mod = jnp.dot(c_act.astype(matmul_dtype), weight.T.astype(matmul_dtype),
                  preferred_element_type=jnp.float32) + bias
    C = x.shape[-1]
    shift, scale, gate = mod[..., :C], mod[..., C:2 * C], mod[..., 2 * C:]
    xf = x.astype(jnp.float32)
    mean = jnp.mean(xf, axis=-1, keepdims=True)
    var = jnp.mean((xf - mean) ** 2, axis=-1, keepdims=True)
    x_norm = (xf - mean) * jax.lax.rsqrt(var + 1e-6)
    return x_norm * (1.0 + scale) + shift, gate


if __name__ == "__main__":
    B, N, C = 2, 8, 32  # (batch, seq, hidden) -- matches the module's (B, N, C)

    key = jax.random.PRNGKey(0)
    kx, kc, kw, kb = jax.random.split(key, 4)
    x = jax.random.normal(kx, (B, N, C), dtype=jnp.float32)
    c = jax.random.normal(kc, (B, N, C), dtype=jnp.float32)

    # NOTE: the module's initialize_weights() zero-inits the Linear; small
    # deterministic random params are used instead so the matmul path is
    # actually exercised (forward semantics are identical either way).
    weight = 0.02 * jax.random.normal(kw, (3 * C, C), dtype=jnp.float32)
    bias = 0.01 * jax.random.normal(kb, (3 * C,), dtype=jnp.float32)

    # Prepare the fused-projection params once (cached per module in real use):
    # transposed, bf16, modulate "+1" folded into the scale-chunk bias.
    w_t, b = prepare_adaln_params(weight, bias)

    out, gate = ada_layer_norm_zero(x, c, w_t, b)
    jax.block_until_ready((out, gate))

    # Tight check against a reference that mirrors the kernel's bf16-MXU math.
    ref_out, ref_gate = _reference(x, c, weight, bias, matmul_dtype=jnp.bfloat16)
    assert jnp.allclose(out, ref_out, atol=1e-4, rtol=1e-4)
    assert jnp.allclose(gate, ref_gate, atol=1e-4, rtol=1e-4)

    # Loose check against the exact (f32) PyTorch-equivalent math.
    f32_out, f32_gate = _reference(x, c, weight, bias, matmul_dtype=jnp.float32)
    assert jnp.allclose(out, f32_out, atol=1e-2)
    assert jnp.allclose(gate, f32_gate, atol=1e-2)

    # Multi-step grid (tile_n=8 -> 2 row tiles, evenly divisible).
    out2, gate2 = ada_layer_norm_zero(x, c, w_t, b, tile_n=8)
    assert jnp.allclose(out2, ref_out, atol=1e-4, rtol=1e-4)
    assert jnp.allclose(gate2, ref_gate, atol=1e-4, rtol=1e-4)

    # Ragged last tile (B*N = 14 rows, tile_n=8 -> 2 tiles, last one partial;
    # no host-side pad/slice -- Pallas masks the out-of-range rows).
    x_odd, c_odd = x[:, :7], c[:, :7]
    out3, gate3 = ada_layer_norm_zero(x_odd, c_odd, w_t, b, tile_n=8)
    ref_out3, ref_gate3 = _reference(x_odd, c_odd, weight, bias,
                                     matmul_dtype=jnp.bfloat16)
    assert jnp.allclose(out3, ref_out3, atol=1e-4, rtol=1e-4)
    assert jnp.allclose(gate3, ref_gate3, atol=1e-4, rtol=1e-4)

    # bf16 activations exercise the no-upcast SiLU fast path.
    out_bf, gate_bf = ada_layer_norm_zero(x.astype(jnp.bfloat16),
                                          c.astype(jnp.bfloat16), w_t, b)
    assert jnp.allclose(out_bf.astype(jnp.float32), f32_out, atol=8e-2)
    assert jnp.allclose(gate_bf.astype(jnp.float32), f32_gate, atol=8e-2)

    print("KERNEL_OK")
</pallas_src>

<mosaic_0001>
module attributes {stable_mosaic.version = 11 : i64} {
  func.func @_adaln_zero_kernel(%arg0: i32, %arg1: memref<16x32xf32, #tpu.memory_space<vmem>>, %arg2: memref<16x32xf32, #tpu.memory_space<vmem>>, %arg3: memref<32x96xbf16, #tpu.memory_space<vmem>>, %arg4: memref<1x96xf32, #tpu.memory_space<vmem>>, %arg5: memref<16x32xf32, #tpu.memory_space<vmem>>, %arg6: memref<16x32xf32, #tpu.memory_space<vmem>>) attributes {dimension_semantics = [#tpu.dimension_semantics<parallel>], iteration_bounds = array<i64: 1>, scalar_prefetch = 0 : i64, scratch_operands = 0 : i64, tpu.core_type = #tpu.core_type<tc>, window_params = [{transform_indices = @transform_0, window_bounds = array<i64: 16, 32>}, {transform_indices = @transform_1, window_bounds = array<i64: 16, 32>}, {pipeline_mode = #tpu.pipeline_mode<synchronous>, transform_indices = @transform_2, window_bounds = array<i64: 32, 96>}, {pipeline_mode = #tpu.pipeline_mode<synchronous>, transform_indices = @transform_3, window_bounds = array<i64: 1, 96>}, {transform_indices = @transform_4, window_bounds = array<i64: 16, 32>}, {transform_indices = @transform_5, window_bounds = array<i64: 16, 32>}]} {
    %c0 = arith.constant 0 : index
    %c0_0 = arith.constant 0 : index
    %0 = vector.load %arg2[%c0, %c0_0] : memref<16x32xf32, #tpu.memory_space<vmem>>, vector<16x32xf32>
    %1 = arith.negf %0 : vector<16x32xf32>
    %2 = math.exp %1 : vector<16x32xf32>
    %cst = arith.constant 1.000000e+00 : f32
    %3 = vector.broadcast %cst : f32 to vector<16x32xf32>
    %4 = arith.addf %3, %2 : vector<16x32xf32>
    %5 = arith.divf %3, %4 : vector<16x32xf32>
    %6 = arith.mulf %0, %5 : vector<16x32xf32>
    %7 = arith.truncf %6 : vector<16x32xf32> to vector<16x32xbf16>
    %c0_1 = arith.constant 0 : index
    %c0_2 = arith.constant 0 : index
    %8 = vector.load %arg3[%c0_1, %c0_2] : memref<32x96xbf16, #tpu.memory_space<vmem>>, vector<32x96xbf16>
    %cst_3 = arith.constant dense<0.000000e+00> : vector<16x96xf32>
    %9 = tpu.matmul %7, %8, %cst_3 {dimension_numbers = #tpu.dot_dimension_numbers<[1], [0], [0], [1], [0, 0, 1, 1], [], []>} : vector<16x32xbf16>, vector<32x96xbf16>, vector<16x96xf32> -> vector<16x96xf32>
    %c0_4 = arith.constant 0 : index
    %c0_5 = arith.constant 0 : index
    %10 = vector.load %arg4[%c0_4, %c0_5] : memref<1x96xf32, #tpu.memory_space<vmem>>, vector<1x96xf32>
    %11 = vector.extract_strided_slice %9 {offsets = [0, 0], sizes = [16, 32], strides = [1, 1]} : vector<16x96xf32> to vector<16x32xf32>
    %12 = vector.extract_strided_slice %10 {offsets = [0, 0], sizes = [1, 32], strides = [1, 1]} : vector<1x96xf32> to vector<1x32xf32>
    %13 = vector.broadcast %12 : vector<1x32xf32> to vector<16x32xf32>
    %14 = arith.addf %11, %13 : vector<16x32xf32>
    %15 = vector.extract_strided_slice %9 {offsets = [0, 32], sizes = [16, 32], strides = [1, 1]} : vector<16x96xf32> to vector<16x32xf32>
    %16 = vector.extract_strided_slice %10 {offsets = [0, 32], sizes = [1, 32], strides = [1, 1]} : vector<1x96xf32> to vector<1x32xf32>
    %17 = vector.broadcast %16 : vector<1x32xf32> to vector<16x32xf32>
    %18 = arith.addf %15, %17 : vector<16x32xf32>
    %19 = vector.extract_strided_slice %9 {offsets = [0, 64], sizes = [16, 32], strides = [1, 1]} : vector<16x96xf32> to vector<16x32xf32>
    %20 = vector.extract_strided_slice %10 {offsets = [0, 64], sizes = [1, 32], strides = [1, 1]} : vector<1x96xf32> to vector<1x32xf32>
    %21 = vector.broadcast %20 : vector<1x32xf32> to vector<16x32xf32>
    %22 = arith.addf %19, %21 : vector<16x32xf32>
    %c0_6 = arith.constant 0 : index
    %c0_7 = arith.constant 0 : index
    %23 = vector.load %arg1[%c0_6, %c0_7] : memref<16x32xf32, #tpu.memory_space<vmem>>, vector<16x32xf32>
    %cst_8 = arith.constant dense<0.000000e+00> : vector<16xf32>
    %24 = vector.multi_reduction <add>, %23, %cst_8 [1] : vector<16x32xf32> to vector<16xf32>
    %25 = vector.shape_cast %24 : vector<16xf32> to vector<16x1xf32>
    %cst_9 = arith.constant 3.125000e-02 : f32
    %26 = vector.broadcast %cst_9 : f32 to vector<16x1xf32>
    %27 = arith.mulf %25, %26 : vector<16x1xf32>
    %28 = arith.mulf %23, %23 : vector<16x32xf32>
    %cst_10 = arith.constant dense<0.000000e+00> : vector<16xf32>
    %29 = vector.multi_reduction <add>, %28, %cst_10 [1] : vector<16x32xf32> to vector<16xf32>
    %30 = vector.shape_cast %29 : vector<16xf32> to vector<16x1xf32>
    %cst_11 = arith.constant 3.125000e-02 : f32
    %31 = vector.broadcast %cst_11 : f32 to vector<16x1xf32>
    %32 = arith.mulf %30, %31 : vector<16x1xf32>
    %33 = arith.mulf %27, %27 : vector<16x1xf32>
    %34 = arith.subf %32, %33 : vector<16x1xf32>
    %cst_12 = arith.constant 0.000000e+00 : f32
    %35 = vector.broadcast %cst_12 : f32 to vector<16x1xf32>
    %36 = arith.maximumf %34, %35 : vector<16x1xf32>
    %37 = vector.broadcast %27 : vector<16x1xf32> to vector<16x32xf32>
    %38 = arith.subf %23, %37 : vector<16x32xf32>
    %cst_13 = arith.constant 9.99999997E-7 : f32
    %39 = vector.broadcast %cst_13 : f32 to vector<16x1xf32>
    %40 = arith.addf %36, %39 : vector<16x1xf32>
    %41 = math.rsqrt %40 : vector<16x1xf32>
    %42 = vector.broadcast %41 : vector<16x1xf32> to vector<16x32xf32>
    %43 = arith.mulf %38, %42 : vector<16x32xf32>
    %44 = arith.mulf %43, %18 : vector<16x32xf32>
    %45 = arith.addf %44, %14 : vector<16x32xf32>
    %c0_14 = arith.constant 0 : index
    %c0_15 = arith.constant 0 : index
    %46 = vector.load %arg5[%c0_14, %c0_15] : memref<16x32xf32, #tpu.memory_space<vmem>>, vector<16x32xf32>
    tpu.vector_store %arg5[%c0_14, %c0_15], %45 {strides = array<i32>} : memref<16x32xf32, #tpu.memory_space<vmem>>, vector<16x32xf32>,
    %c0_16 = arith.constant 0 : index
    %c0_17 = arith.constant 0 : index
    %47 = vector.load %arg6[%c0_16, %c0_17] : memref<16x32xf32, #tpu.memory_space<vmem>>, vector<16x32xf32>
    tpu.vector_store %arg6[%c0_16, %c0_17], %22 {strides = array<i32>} : memref<16x32xf32, #tpu.memory_space<vmem>>, vector<16x32xf32>,
    return
  }
  func.func @transform_0(%arg0: i32) -> (i32, i32) {
    %c0_i32 = arith.constant 0 : i32
    %c0_i32_0 = arith.constant 0 : i32
    return %arg0, %c0_i32 : i32, i32
  }
  func.func @transform_1(%arg0: i32) -> (i32, i32) {
    %c0_i32 = arith.constant 0 : i32
    %c0_i32_0 = arith.constant 0 : i32
    return %arg0, %c0_i32 : i32, i32
  }
  func.func @transform_2(%arg0: i32) -> (i32, i32) {
    %c0_i32 = arith.constant 0 : i32
    %c0_i32_0 = arith.constant 0 : i32
    %c0_i32_1 = arith.constant 0 : i32
    return %c0_i32, %c0_i32_0 : i32, i32
  }
  func.func @transform_3(%arg0: i32) -> (i32, i32) {
    %c0_i32 = arith.constant 0 : i32
    %c0_i32_0 = arith.constant 0 : i32
    %c0_i32_1 = arith.constant 0 : i32
    return %c0_i32, %c0_i32_0 : i32, i32
  }
  func.func @transform_4(%arg0: i32) -> (i32, i32) {
    %c0_i32 = arith.constant 0 : i32
    %c0_i32_0 = arith.constant 0 : i32
    return %arg0, %c0_i32 : i32, i32
  }
  func.func @transform_5(%arg0: i32) -> (i32, i32) {
    %c0_i32 = arith.constant 0 : i32
    %c0_i32_0 = arith.constant 0 : i32
    return %arg0, %c0_i32 : i32, i32
  }
}

</mosaic_0001>

<bundles_post_ra>
// kernel: tpu_custom_call.1
= control target key start
LH: loop header
LB: loop body
LE: loop exit
PB: predicated region body
PF: predicated region fallthrough
CT: control target
= control target key end

     0   :  { %11 = vsyncpa [#allocation3], 0  ;;  %s557_s0 = inlined_call_operand.hbm [shape: f32[16,32], index: 0, kind: input, shape index: {}]   ;;  %s558_s1 = inlined_call_operand.hbm [shape: f32[16,32], index: 1, kind: input, shape index: {}]   ;;  %s559_s2 = inlined_call_operand.hbm [shape: bf16[32,96], index: 2, kind: input, shape index: {}]   ;;  %s560_s3 = inlined_call_operand.vmem [shape: f32[1,96], index: 3, kind: input, shape index: {}]   ;;  %s561_s4 = inlined_call_operand.hbm [shape: f32[16,32], index: 4, kind: output, shape index: {0}]   ;;  %s562_s5 = inlined_call_operand.hbm [shape: f32[16,32], index: 5, kind: output, shape index: {1}]  }
   0x1   :  { %12 = vsyncpa [#allocation6], 0 }
   0x2   :  { %13 = vsyncpa [#allocation4], 0 }
   0x3   :  { %14 = vsyncpa [#allocation10], 0  ;;  %s401_s18 = smov [#allocation5]   ;;  %s402_s20 = smov [#allocation2]  }
   0x4   :  { %s32_s19 = sshll.u32 %s401_s18, 4  ;;  %s20_s21 = sshll.u32 %s402_s20, 4  ;;  %s33_s19 = int_to_ptr.vmem [resolvable:$true] %s32_s19  ;;  %s443_s21 = int_to_ptr.vmem [resolvable:$true] %s20_s21 }
   0x5   :  { %s283_s24 = scalar_lea.hbm %s558_s1, 256 }
   0x6   :  { %p284_p0 = scmp.ne.s32.totalorder %s558_s1, %s283_s24  ;;  %p287_p1 = scmp.lt.u32.totalorder %s283_s24, %s558_s1 }
   0x8   :  { %p289_p2 = pnand %p287_p1, %p284_p0 }
   0xa   :  { %292 = shalt.err (!%p289_p2)
}
   0xb   :  { %s293_s29 = scalar_lea.vmem %s33_s19, 256  ;;  %p298_p4 = scmp.lt.s32.totalorder %s33_s19, %s33_s19 }
   0xc   :  { %p294_p3 = scmp.ne.s32.totalorder %s33_s19, %s293_s29  ;;  %p299_p5 = scmp.lt.s32.totalorder %s293_s29, %s293_s29 }
   0xe   :  { %p300_p6 = por %p299_p5, %p298_p4 }
  0x10   :  { %p301_p7 = pnand %p300_p6, %p294_p3 }
  0x12   :  { %304 = shalt.err (!%p301_p7)
}
  0x13   :  { %s403_s30 = smov 128   ;;  %s404_s6 = smov 8  }
  0x14   :  { %38 = dma.hbm_to_vmem [thread:$0]  %s558_s1, 256, %s33_s19, [#allocation6], %s403_s30, %s403_s30, %s404_s6  }
  0x15   :  { %s305_s11 = scalar_lea.hbm %s557_s0, 256 }
  0x16   :  { %p306_p8 = scmp.ne.s32.totalorder %s557_s0, %s305_s11  ;;  %p309_p9 = scmp.lt.u32.totalorder %s305_s11, %s557_s0 }
  0x18   :  { %p311_p10 = pnand %p309_p9, %p306_p8 }
  0x1a   :  { %314 = shalt.err (!%p311_p10)
}
  0x1b   :  { %s315_s16 = scalar_lea.vmem %s443_s21, 256  ;;  %p320_p12 = scmp.lt.s32.totalorder %s443_s21, %s443_s21 }
  0x1c   :  { %p316_p11 = scmp.ne.s32.totalorder %s443_s21, %s315_s16  ;;  %p321_p13 = scmp.lt.s32.totalorder %s315_s16, %s315_s16 }
  0x1e   :  { %p322_p0 = por %p321_p13, %p320_p12 }
  0x20   :  { %p323_p1 = pnand %p322_p0, %p316_p11 }
  0x22   :  { %326 = shalt.err (!%p323_p1)
}
  0x23   :  { %26 = dma.hbm_to_vmem [thread:$0]  %s557_s0, 256, %s443_s21, [#allocation3], %s403_s30, %s403_s30, %s404_s6  }
  0x24   :  { %s405_s18 = smov [#allocation7]   ;;  %s327_s23 = scalar_lea.hbm %s559_s2, 256 }
  0x25   :  { %s44_s19 = sshll.u32 %s405_s18, 4  ;;  %p328_p2 = scmp.ne.s32.totalorder %s559_s2, %s327_s23  ;;  %s45_s19 = int_to_ptr.vmem [resolvable:$true] %s44_s19 }
  0x26   :  { %p331_p3 = scmp.lt.u32.totalorder %s327_s23, %s559_s2 }
  0x28   :  { %p333_p4 = pnand %p331_p3, %p328_p2 }
  0x2a   :  { %336 = shalt.err (!%p333_p4)
}
  0x2b   :  { %s337_s28 = scalar_lea.vmem %s45_s19, 256  ;;  %p342_p6 = scmp.lt.s32.totalorder %s45_s19, %s45_s19 }
  0x2c   :  { %p338_p5 = scmp.ne.s32.totalorder %s45_s19, %s337_s28  ;;  %p343_p7 = scmp.lt.s32.totalorder %s337_s28, %s337_s28 }
  0x2e   :  { %p344_p8 = por %p343_p7, %p342_p6 }
  0x30   :  { %p345_p9 = pnand %p344_p8, %p338_p5 }
  0x32   :  { %348 = shalt.err (!%p345_p9)
}
  0x33   :  { %s406_s0 = smov 64   ;;  %s407_s21 = smov 4  }
  0x34   :  { %50 = dma.hbm_to_vmem [thread:$0]  %s559_s2, 256, %s45_s19, [#allocation6], %s406_s0, %s406_s0, %s407_s21  }
  0x35   :  { %393 = dma.done.wait [#allocation3], 256  }
  0x36   :  { %394 = vsyncadd [#allocation3], 4294967040 }
  0x37   :  { %395 = dma.done.wait [#allocation6], 512  }
  0x38   :  { %396 = vsyncadd [#allocation6], 4294966784  ;;  %v408_v0 = vmov 0.0   ;;  %vm409_vm0 = vmmov 0   ;;  %v269_v1 = vld [vmem:[#allocation7] sm:$0xff]   ;;  %v270_v2 = vld [vmem:[#allocation7 + $0x8] sm:$0xff]  }
  0x39   :  { %249 = vmatprep.subr.bf16.mxu0 %v408_v0  ;;  %253 = vmatprep.mubr.msk.bf16.mxu0 %vm409_vm0, %v408_v0  ;;  %v63_v3 = vld [vmem:[#allocation5] sm:$0xff]  ;;  %v64_v4 = vld [vmem:[#allocation5 + $0x8] sm:$0xff]  ;;  %vm96_vm1 = vcmask 261120   ;;  %v494_v5 = vld [vmem:[#allocation2] sm:$0xff]  ;;  %s410_s9 = smov 96   ;;  %s412_s11 = smov [#allocation9]  }
  0x3a   :  { %250 = vmatpush3.bf16.msra.mxu0 %v269_v1  ;;  %v240_v6 = vmul.f32 -1.442695, %v63_v3  ;;  %v241_v7 = vmul.f32 -1.442695, %v64_v4  ;;  %v152_v8 = vsel %vm96_vm1, %v494_v5, 0.0  ;;  %v160_v9 = vmul.f32 %v494_v5, %v494_v5  ;;  %v500_v10 = vld [vmem:[#allocation2 + $0x8] sm:$0xff] }
  0x3b   :  { %251 = vmatprep.subr.bf16.mxu0 %v408_v0  ;;  %153 = vadd.xlane.f32.xlu0 %v152_v8  ;;  %v161_v11 = vmul.f32 %v500_v10, %v500_v10  ;;  %v155_v13 = vsel %vm96_vm1, %v500_v10, 0.0  ;;  %v245_v24 = vld [vmem:[%s560_s3] ss:$0 sm:$0xff]  ;;  %s411_s3 = smov [#allocation8]   ;;  %s223_s12 = sshll.u32 %s412_s11, 4  ;;  %s518_s12 = int_to_ptr.vmem [resolvable:$true] %s223_s12 }
  0x3c   :  { %271 = vpow2.f32 %v240_v6  ;;  %v162_v12 = vsel %vm96_vm1, %v160_v9, 0.0  ;;  %s211_s10 = sshll.u32 %s411_s3, 4  ;;  %s212_s10 = int_to_ptr.vmem [resolvable:$true] %s211_s10 }
  0x3d   :  { %273 = vpow2.f32 %v241_v7  ;;  %163 = vadd.xlane.f32.xlu1 %v162_v12  ;;  %v165_v14 = vsel %vm96_vm1, %v161_v11, 0.0  ;;  %s349_s13 = scalar_lea.vmem %s212_s10, 256  ;;  %p354_p11 = scmp.lt.s32.totalorder %s212_s10, %s212_s10 }
  0x3e   :  { %252 = vmatpush3.bf16.msra.mxu0 %v270_v2  ;;  %p350_p10 = scmp.ne.s32.totalorder %s212_s10, %s349_s13  ;;  %p355_p12 = scmp.lt.s32.totalorder %s349_s13, %s349_s13 }
  0x3f   :  { %156 = vadd.xlane.f32.xlu0 %v155_v13 }
  0x40   :  { %p356_p13 = por %p355_p12, %p354_p11 }
  0x41   :  { %166 = vadd.xlane.f32.xlu1 %v165_v14 }
  0x42   :  { %p357_p0 = pnand %p356_p13, %p350_p10 }
  0x46   :  { %v272_v15 = vpop.eup %271 }
  0x47   :  { %v274_v16 = vpop.eup %273  ;;  %v71_v17 = vadd.f32 1.0, %v272_v15 }
  0x48   :  { %v72_v18 = vadd.f32 1.0, %v274_v16 }
  0x49   :  { %275 = vrcp.f32 %v71_v17 }
  0x4a   :  { %277 = vrcp.f32 %v72_v18 }
  0x53   :  { %v276_v19 = vpop.eup %275 }
  0x54   :  { %v278_v20 = vpop.eup %277  ;;  %v77_v21 = vmul.f32 %v276_v19, %v63_v3 }
  0x55   :  { %v78_v22 = vmul.f32 %v278_v20, %v64_v4 }
  0x57   :  { %v79_v23 = vpack.c.bf16 %v78_v22, %v77_v21 }
  0x59   :  { %254 = vmatmul.mubr.msk.bf16.vlgmr.msra.gmra.mrb[0].mxu0 %vm96_vm1, %v79_v23 }
  0xc8   :  { %v154_v31 = vpop.xlane.xlu0 %153 }
  0xc9   :  { %v158_v33 = vmul.f32 0.03125, %v154_v31 }
  0xca   :  { %v164_v32 = vpop.xlane.xlu1 %163 }
  0xcb   :  { %v170_v35 = vmul.f32 %v158_v33, %v158_v33  ;;  %v168_v36 = vmul.f32 0.03125, %v164_v32  ;;  %v176_v47 = vsub.f32 %v494_v5, %v158_v33 }
  0xcc   :  { %v157_v34 = vpop.xlane.xlu0 %156 }
  0xcd   :  { %v159_v37 = vmul.f32 0.03125, %v157_v34  ;;  %v172_v39 = vsub.f32 %v168_v36, %v170_v35 }
  0xce   :  { %v167_v38 = vpop.xlane.xlu1 %166 }
  0xcf   :  { %v171_v40 = vmul.f32 %v159_v37, %v159_v37  ;;  %v169_v41 = vmul.f32 0.03125, %v167_v38  ;;  %v174_v42 = vmax.f32 %v172_v39, 0.0  ;;  %v177_v49 = vsub.f32 %v500_v10, %v159_v37 }
  0xd1   :  { %v173_v43 = vsub.f32 %v169_v41, %v171_v40  ;;  %v178_v44 = vadd.f32 1e-06, %v174_v42 }
  0xd3   :  { %v175_v45 = vmax.f32 %v173_v43, 0.0  ;;  %279 = vrsqrt.f32 %v178_v44 }
  0xd5   :  { %v179_v46 = vadd.f32 1e-06, %v175_v45 }
  0xd7   :  { %281 = vrsqrt.f32 %v179_v46 }
  0xdd   :  { %v280_v48 = vpop.eup %279 }
  0xde   :  { %v182_v50 = vmul.f32 %v280_v48, %v176_v47 }
  0xe1   :  { %v282_v51 = vpop.eup %281 }
  0xe2   :  { %v183_v56 = vmul.f32 %v282_v51, %v177_v49 }
 0x12c   :  { %v134_v25 = vpop.f32.mrb[0].mxu0 }
 0x12d   :  { %v148_v26 = vadd.f32 %v245_v24, %v134_v25  ;;  %v255_v27 = vpop.f32.mrb[1].mxu0 }
 0x12e   :  { %v137_v28 = vpop.f32.mrb[2].mxu0 }
 0x12f   :  { %198 = vrot.lane.b32.xlu1 %v148_v26, %s406_s0  ;;  %186 = vrot.lane.b32.xlu0 %v148_v26, %s410_s9  ;;  %v256_v29 = vpop.f32.mrb[3].mxu0  ;;  %v149_v30 = vadd.f32 %v245_v24, %v137_v28 }
 0x133   :  { %188 = vrot.lane.b32.xlu1 %v149_v30, %s410_s9 }
 0x137   :  { %200 = vrot.lane.b32.xlu1 %v149_v30, %s406_s0 }
 0x1a1   :  { %v199_v52 = vpop.permute.xlu1 %198  ;;  %v187_v53 = vpop.permute.xlu0 %186 }
 0x1a2   :  { %204 = vst.msk [vmem:[#allocation9] sm:$0xff] %vm96_vm1, %v199_v52  ;;  %v192_v54 = vmul.f32 %v187_v53, %v182_v50 }
 0x1a4   :  { %v194_v55 = vadd.f32 %v192_v54, %v148_v26 }
 0x1a5   :  { %v189_v57 = vpop.permute.xlu1 %188 }
 0x1a6   :  { %196 = vst.msk [vmem:[#allocation8] sm:$0xff] %vm96_vm1, %v194_v55  ;;  %v193_v58 = vmul.f32 %v189_v57, %v183_v56 }
 0x1a8   :  { %v195_v59 = vadd.f32 %v193_v58, %v149_v30 }
 0x1a9   :  { %v201_v60 = vpop.permute.xlu1 %200 }
 0x1aa   :  { %197 = vst.msk [vmem:[#allocation8 + $0x8] sm:$0xff] %vm96_vm1, %v195_v59  ;;  %205 = vst.msk [vmem:[#allocation9 + $0x8] sm:$0xff] %vm96_vm1, %v201_v60 }
 0x1ab   :  { %360 = shalt.err (!%p357_p0)
}
 0x1ac   :  { %s361_s16 = scalar_lea.hbm %s561_s4, 256 }
 0x1ad   :  { %p362_p1 = scmp.ne.s32.totalorder %s561_s4, %s361_s16  ;;  %p365_p2 = scmp.lt.u32.totalorder %s361_s16, %s561_s4 }
 0x1af   :  { %p367_p3 = pnand %p365_p2, %p362_p1 }
 0x1b1   :  { %370 = shalt.err (!%p367_p3)
}
 0x1b2   :  { %217 = dma.vmem_to_hbm [thread:$0]  %s212_s10, 256, %s561_s4, [#allocation4], %s403_s30, %s403_s30, %s404_s6  }
 0x1b3   :  { %s371_s23 = scalar_lea.vmem %s518_s12, 256  ;;  %p376_p5 = scmp.lt.s32.totalorder %s518_s12, %s518_s12 }
 0x1b4   :  { %p372_p4 = scmp.ne.s32.totalorder %s518_s12, %s371_s23  ;;  %p377_p6 = scmp.lt.s32.totalorder %s371_s23, %s371_s23 }
 0x1b6   :  { %p378_p7 = por %p377_p6, %p376_p5 }
 0x1b8   :  { %p379_p8 = pnand %p378_p7, %p372_p4 }
 0x1ba   :  { %382 = shalt.err (!%p379_p8)
}
 0x1bb   :  { %s383_s26 = scalar_lea.hbm %s562_s5, 256 }
 0x1bc   :  { %p384_p9 = scmp.ne.s32.totalorder %s562_s5, %s383_s26  ;;  %p387_p10 = scmp.lt.u32.totalorder %s383_s26, %s562_s5 }
 0x1be   :  { %p389_p11 = pnand %p387_p10, %p384_p9 }
 0x1c0   :  { %392 = shalt.err (!%p389_p11)
}
 0x1c1   :  { %229 = dma.vmem_to_hbm [thread:$0]  %s518_s12, 256, %s562_s5, [#allocation10], %s403_s30, %s403_s30, %s404_s6  }
 0x1c2   :  { %397 = dma.done.wait [#allocation4], 256  }
 0x1c3   :  { %398 = vsyncadd [#allocation4], 4294967040 }
 0x1c4   :  { %399 = dma.done.wait [#allocation10], 256  }
 0x1c5   :  { %400 = vsyncadd [#allocation10], 4294967040 }
 0x1c6   :  { %236 = vsyncpa [#allocation3], 1 }
 0x1c7   :  { %237 = vsyncpa [#allocation6], 1 }
 0x1c8   :  { %238 = vsyncpa [#allocation4], 1 }
 0x1c9   :  { %239 = vsyncpa [#allocation10], 1 }

</bundles_post_ra>
